<compile_context>
chip_gen: v5e
topology: v5e:2x2
jax: 0.10.0
libtpu: 0.0.40
codegen_flags: <defaults>
</compile_context>

<pallas_src>
import functools

import jax
import jax.numpy as jnp
from jax import lax
from jax.experimental import pallas as pl
from jax.experimental.pallas import tpu as pltpu

_EPS = 1e-8  # torch.cosine_similarity default eps


def _cos_sq_err_kernel(a_ref, b_ref, lbl_ref, out_ref, *, block_b, total_rows):
    i = pl.program_id(0)

    a = a_ref[...].astype(jnp.float32)          # (block_b, D)
    b = b_ref[...].astype(jnp.float32)          # (block_b, D)

    dot = jnp.sum(a * b, axis=-1)               # (block_b,)
    sa = jnp.sum(a * a, axis=-1)                # (block_b,)
    sb = jnp.sum(b * b, axis=-1)                # (block_b,)

    # torch clamps each norm to eps:
    #   max(sqrt(sa), eps) * max(sqrt(sb), eps) == sqrt(max(sa, eps^2) * max(sb, eps^2))
    denom_sq = jnp.maximum(sa, _EPS * _EPS) * jnp.maximum(sb, _EPS * _EPS)
    cos = dot * lax.rsqrt(denom_sq)             # (block_b,)

    lbl = lbl_ref[0]                            # (1, block_b), lane-dense
    diff = cos.reshape(1, block_b) - lbl
    sq = diff * diff                            # (1, block_b)

    # Mask rows past the true batch size (last, partial tile).  Keep as select.
    row = lax.broadcasted_iota(jnp.int32, (1, block_b), 1) + i * block_b
    sq = jnp.where(row < total_rows, sq, jnp.float32(0.0))

    out_ref[0] = sq                             # lane-dense per-row partials


def _vmem_capacity_bytes():
    default = 64 * 1024 * 1024
    try:
        info = pltpu.get_tpu_info()
        cap = int(getattr(info, "vmem_capacity_bytes", default))
    except Exception:  # pragma: no cover - conservative fallback
        cap = default
    return min(max(cap, 32 * 1024 * 1024), 128 * 1024 * 1024)


def _per_row_vmem_bytes(D, itemsize):
    # 2 inputs x 2 pipeline buffers (native dtype) + ~4 tile-rows of f32
    # working set (casts + product temporaries) + lane-dense label/out blocks.
    return 4 * D * itemsize + 16 * D + 128


def _pick_block_b(B, D, itemsize, vmem_cap):
    """Batch tile sized from dtype + device VMEM; >=2 blocks for megacore."""
    per_row = _per_row_vmem_bytes(D, itemsize)
    usable = min(vmem_cap - 24 * 1024 * 1024, 80 * 1024 * 1024)
    usable = max(usable, 4 * 1024 * 1024)
    rows = usable // per_row
    rows = max(8, (min(int(rows), 32768) // 8) * 8)
    b_padded = ((B + 7) // 8) * 8
    rows = min(rows, b_padded)
    if B >= 16:
        # Keep at least 2 blocks so the "parallel" axis can shard across TCs.
        half = (((B + 1) // 2) + 7) // 8 * 8
        rows = min(rows, max(8, half))
    return rows


def cosine_similarity_loss(rep_a, rep_b, label, *, block_b=None):
    """Pallas TPU implementation of CosineSimilarityLoss.forward (MSE + identity)."""
    B, D = rep_a.shape
    assert rep_b.shape == (B, D)
    itemsize = jnp.dtype(rep_a.dtype).itemsize
    vmem_cap = _vmem_capacity_bytes()

    if block_b is None:
        block_b = _pick_block_b(B, D, itemsize, vmem_cap)
    block_b = max(8, (int(block_b) // 8) * 8)
    b_ceil = ((B + 7) // 8) * 8
    block_b = min(block_b, b_ceil)

    num_blocks = pl.cdiv(B, block_b)
    b_padded = num_blocks * block_b

    # Lane-dense, blocked label: (num_blocks, 1, block_b) f32, zero padded.
    lbl = jnp.zeros((b_padded,), jnp.float32)
    lbl = lbl.at[:B].set(label.reshape(-1).astype(jnp.float32))
    lbl = lbl.reshape(num_blocks, 1, block_b)

    # Scoped-VMEM limit derived from the actual per-step budget (+ headroom for
    # Mosaic internal scratch), kept under the physical capacity.
    vmem_limit = min(vmem_cap - 8 * 1024 * 1024,
                     block_b * _per_row_vmem_bytes(D, itemsize) + 32 * 1024 * 1024)

    kernel = functools.partial(_cos_sq_err_kernel, block_b=block_b, total_rows=B)

    sq = pl.pallas_call(
        kernel,
        out_shape=jax.ShapeDtypeStruct((num_blocks, 1, block_b), jnp.float32),
        grid_spec=pltpu.PrefetchScalarGridSpec(
            num_scalar_prefetch=0,
            grid=(num_blocks,),
            in_specs=[
                pl.BlockSpec((block_b, D), lambda i: (i, 0)),        # rep_a tile
                pl.BlockSpec((block_b, D), lambda i: (i, 0)),        # rep_b tile
                pl.BlockSpec((1, 1, block_b), lambda i: (i, 0, 0)),  # label row
            ],
            out_specs=pl.BlockSpec((1, 1, block_b), lambda i: (i, 0, 0)),
        ),
        compiler_params=pltpu.CompilerParams(
            dimension_semantics=("parallel",),   # independent blocks -> both TCs
            vmem_limit_bytes=int(vmem_limit),
        ),
    )(rep_a, rep_b, lbl)

    # Tiny final reduction (<= b_padded floats) in plain XLA.
    return jnp.sum(sq) / jnp.float32(B)


def _reference(rep_a, rep_b, label):
    a = rep_a.astype(jnp.float32)
    b = rep_b.astype(jnp.float32)
    dot = jnp.sum(a * b, axis=-1)
    na = jnp.sqrt(jnp.sum(a * a, axis=-1))
    nb = jnp.sqrt(jnp.sum(b * b, axis=-1))
    cos = dot / (jnp.maximum(na, _EPS) * jnp.maximum(nb, _EPS))
    return jnp.mean((cos - label.reshape(-1).astype(jnp.float32)) ** 2)


if __name__ == "__main__":
    key = jax.random.PRNGKey(0)
    k1, k2, k3, k4, k5, k6 = jax.random.split(key, 6)

    # Base case: batch=16, hidden=32.  The >=2-block policy makes this run
    # with block_b=8 -> 2 grid steps, exercising the multi-block path.
    B, D = 16, 32
    rep_a = jax.random.normal(k1, (B, D), dtype=jnp.float32)
    rep_b = jax.random.normal(k2, (B, D), dtype=jnp.float32)
    label = jax.random.uniform(k3, (B,), dtype=jnp.float32)

    loss = jax.block_until_ready(cosine_similarity_loss(rep_a, rep_b, label))
    ref = _reference(rep_a, rep_b, label)
    assert jnp.allclose(loss, ref, atol=1e-5, rtol=1e-5), (loss, ref)

    # Ragged batch, single oversize block (in-kernel row mask).
    B2 = 12
    loss2 = jax.block_until_ready(
        cosine_similarity_loss(rep_a[:B2], rep_b[:B2], label[:B2]))
    ref2 = _reference(rep_a[:B2], rep_b[:B2], label[:B2])
    assert jnp.allclose(loss2, ref2, atol=1e-5, rtol=1e-5), (loss2, ref2)

    # Several blocks + ragged last block + bf16 inputs (explicit small block_b).
    B3, D3 = 200, 128
    ra3 = jax.random.normal(k4, (B3, D3), dtype=jnp.float32).astype(jnp.bfloat16)
    rb3 = jax.random.normal(k5, (B3, D3), dtype=jnp.float32).astype(jnp.bfloat16)
    lb3 = jax.random.uniform(k6, (B3,), dtype=jnp.float32)
    loss3 = jax.block_until_ready(
        cosine_similarity_loss(ra3, rb3, lb3, block_b=64))
    ref3 = _reference(ra3, rb3, lb3)
    assert jnp.allclose(loss3, ref3, atol=1e-4, rtol=1e-4), (loss3, ref3)

    print("KERNEL_OK")
</pallas_src>

<mosaic_0001>
module attributes {stable_mosaic.version = 11 : i64} {
  func.func @_cos_sq_err_kernel(%arg0: i32, %arg1: memref<8x32xf32, #tpu.memory_space<vmem>>, %arg2: memref<8x32xf32, #tpu.memory_space<vmem>>, %arg3: memref<1x1x8xf32, #tpu.memory_space<vmem>>, %arg4: memref<1x1x8xf32, #tpu.memory_space<vmem>>) attributes {dimension_semantics = [#tpu.dimension_semantics<parallel>], iteration_bounds = array<i64: 2>, scalar_prefetch = 0 : i64, scratch_operands = 0 : i64, tpu.core_type = #tpu.core_type<tc>, window_params = [{transform_indices = @transform_0, window_bounds = array<i64: 8, 32>}, {transform_indices = @transform_1, window_bounds = array<i64: 8, 32>}, {transform_indices = @transform_2, window_bounds = array<i64: 1, 1, 8>}, {transform_indices = @transform_3, window_bounds = array<i64: 1, 1, 8>}]} {
    %c0 = arith.constant 0 : index
    %c0_0 = arith.constant 0 : index
    %0 = vector.load %arg1[%c0, %c0_0] : memref<8x32xf32, #tpu.memory_space<vmem>>, vector<8x32xf32>
    %c0_1 = arith.constant 0 : index
    %c0_2 = arith.constant 0 : index
    %1 = vector.load %arg2[%c0_1, %c0_2] : memref<8x32xf32, #tpu.memory_space<vmem>>, vector<8x32xf32>
    %2 = arith.mulf %0, %1 : vector<8x32xf32>
    %cst = arith.constant dense<0.000000e+00> : vector<8xf32>
    %3 = vector.multi_reduction <add>, %2, %cst [1] : vector<8x32xf32> to vector<8xf32>
    %4 = arith.mulf %0, %0 : vector<8x32xf32>
    %cst_3 = arith.constant dense<0.000000e+00> : vector<8xf32>
    %5 = vector.multi_reduction <add>, %4, %cst_3 [1] : vector<8x32xf32> to vector<8xf32>
    %6 = arith.mulf %1, %1 : vector<8x32xf32>
    %cst_4 = arith.constant dense<0.000000e+00> : vector<8xf32>
    %7 = vector.multi_reduction <add>, %6, %cst_4 [1] : vector<8x32xf32> to vector<8xf32>
    %cst_5 = arith.constant 1.000000e-16 : f32
    %8 = vector.broadcast %cst_5 : f32 to vector<8xf32>
    %9 = arith.maximumf %5, %8 : vector<8xf32>
    %cst_6 = arith.constant 1.000000e-16 : f32
    %10 = vector.broadcast %cst_6 : f32 to vector<8xf32>
    %11 = arith.maximumf %7, %10 : vector<8xf32>
    %12 = arith.mulf %9, %11 : vector<8xf32>
    %13 = math.rsqrt %12 : vector<8xf32>
    %14 = arith.mulf %3, %13 : vector<8xf32>
    %c0_7 = arith.constant 0 : index
    %c0_8 = arith.constant 0 : index
    %c0_9 = arith.constant 0 : index
    %15 = vector.load %arg3[%c0_7, %c0_8, %c0_9] : memref<1x1x8xf32, #tpu.memory_space<vmem>>, vector<1x1x8xf32>
    %16 = vector.shape_cast %15 : vector<1x1x8xf32> to vector<1x8xf32>
    %17 = vector.shape_cast %14 : vector<8xf32> to vector<1x8xf32>
    %18 = arith.subf %17, %16 : vector<1x8xf32>
    %19 = arith.mulf %18, %18 : vector<1x8xf32>
    %20 = tpu.iota {dimensions = array<i32: 1>} : vector<1x8xi32>
    %c8_i32 = arith.constant 8 : i32
    %21 = arith.muli %arg0, %c8_i32 : i32
    %22 = vector.broadcast %21 : i32 to vector<1x8xi32>
    %23 = arith.addi %20, %22 : vector<1x8xi32>
    %c16_i32 = arith.constant 16 : i32
    %24 = vector.broadcast %c16_i32 : i32 to vector<1x8xi32>
    %25 = arith.cmpi slt, %23, %24 : vector<1x8xi32>
    %cst_10 = arith.constant 0.000000e+00 : f32
    %26 = vector.broadcast %cst_10 : f32 to vector<1x8xf32>
    %27 = arith.select %25, %19, %26 : vector<1x8xi1>, vector<1x8xf32>
    %c0_11 = arith.constant 0 : index
    %c0_12 = arith.constant 0 : index
    %c0_13 = arith.constant 0 : index
    %28 = vector.load %arg4[%c0_11, %c0_12, %c0_13] : memref<1x1x8xf32, #tpu.memory_space<vmem>>, vector<1x1x8xf32>
    %29 = vector.shape_cast %28 : vector<1x1x8xf32> to vector<1x8xf32>
    %30 = vector.shape_cast %27 : vector<1x8xf32> to vector<1x1x8xf32>
    tpu.vector_store %arg4[%c0_11, %c0_12, %c0_13], %30 {strides = array<i32>} : memref<1x1x8xf32, #tpu.memory_space<vmem>>, vector<1x1x8xf32>,
    return
  }
  func.func @transform_0(%arg0: i32) -> (i32, i32) {
    %c0_i32 = arith.constant 0 : i32
    %c0_i32_0 = arith.constant 0 : i32
    return %arg0, %c0_i32 : i32, i32
  }
  func.func @transform_1(%arg0: i32) -> (i32, i32) {
    %c0_i32 = arith.constant 0 : i32
    %c0_i32_0 = arith.constant 0 : i32
    return %arg0, %c0_i32 : i32, i32
  }
  func.func @transform_2(%arg0: i32) -> (i32, i32, i32) {
    %c0_i32 = arith.constant 0 : i32
    %c0_i32_0 = arith.constant 0 : i32
    %c0_i32_1 = arith.constant 0 : i32
    return %arg0, %c0_i32, %c0_i32_0 : i32, i32, i32
  }
  func.func @transform_3(%arg0: i32) -> (i32, i32, i32) {
    %c0_i32 = arith.constant 0 : i32
    %c0_i32_0 = arith.constant 0 : i32
    %c0_i32_1 = arith.constant 0 : i32
    return %arg0, %c0_i32, %c0_i32_0 : i32, i32, i32
  }
}

</mosaic_0001>

<bundles_post_ra>
// kernel: tpu_custom_call.1
= control target key start
LH: loop header
LB: loop body
LE: loop exit
PB: predicated region body
PF: predicated region fallthrough
CT: control target
= control target key end

     0   :  { %s870_s0 = inlined_call_operand.hbm [shape: f32[16,32], index: 0, kind: input, shape index: {}]   ;;  %s871_s1 = inlined_call_operand.hbm [shape: f32[16,32], index: 1, kind: input, shape index: {}]   ;;  %s872_s2 = inlined_call_operand.hbm [shape: f32[2,1,8], index: 2, kind: input, shape index: {}]   ;;  %s873_s3 = inlined_call_operand.hbm [shape: f32[2,1,8], index: 3, kind: output, shape index: {}]  }
   0x1   :  { %874 = sst [smem:[#allocation12_spill]] %s871_s1 }
   0x2   :  { %8 = vsyncpa [#allocation3], 0 }
   0x3   :  { %10 = vsyncpa [#allocation3 + $0x1], 0 }
   0x4   :  { %11 = vsyncpa [#allocation6], 0 }
   0x5   :  { %13 = vsyncpa [#allocation6 + $0x1], 0 }
   0x6   :  { %14 = vsyncpa [#allocation4], 0 }
   0x7   :  { %16 = vsyncpa [#allocation4 + $0x1], 0  ;;  %s691_s12 = smov 0   ;;  %s693_s13 = smov 0  }
   0x8   :  { %s695_s14 = smov 0   ;;  %s697_s15 = smov 0  }
   0x9 LB: > { %s712_s16 = sadd.s32 4294967295, %s668_s15   ;;  %s432_s17 = sadd.s32 4294967294, %s668_s15   ;;  %s668_s15 = sphi %s697_s15, %s884_s15   ;;  %s664_s14 = sphi %s695_s14, %s883_s14   ;;  %s660_s13 = sphi %s693_s13, %s882_s13   ;;  %s656_s12 = sphi %s691_s12, %s881_s12  }
   0xa   : > { %s716_s18 = sadd.s32 1, %s668_s15   ;;  %s29_s19 = sadd.s32 1, %s664_s14 }
   0xb   : > { %s26_s20 = ssub.s32 %s668_s15, %s716_s18  ;;  %p36_p0 = scmp.ne.s32.totalorder %s664_s14, %s660_s13 }
   0xc   : > { %p27_p1 = scmp.eq.s32.totalorder %s26_s20, 0  ;;  %p37_p2 = scmp.eq.s32.totalorder %s668_s15, 0 }
   0xd   : > { %p42_p3 = scmp.ne.s32.totalorder %s660_s13, %s656_s12  ;;  %p43_p4 = scmp.eq.s32.totalorder %s712_s16, 0 }
   0xe   : > { %s728_s21 = scalar_select %p27_p1, %s664_s14, %s29_s19  }
   0xf   : > { %p38_p5 = por %p37_p2, %p36_p0  ;;  %p730_p6 = por %p43_p4, %p42_p3 }
  0x10   : > { %p118_p7 = scmp.eq.s32.totalorder %s712_s16, 1  ;;  %p124_p8 = scmp.eq.s32.totalorder %s432_s17, 1 }
  0x11   : > { %p434_p9 = scmp.ge.s32.totalorder %s668_s15, 2  ;;  %p467_p10 = scmp.lt.s32.totalorder %s668_s15, 2 }
  0x12   : > { %p737_p11 = por %p118_p7, %p36_p0  ;;  %p741_p12 = por %p124_p8, %p42_p3 }
  0x13   : > { %s746_s25 = sand.u32 1, %s664_s14   ;;  %s436_s26 = sshll.u32 %s668_s15, 3 }
  0x14   : > { %s435_s27 = sshll.u32 %s746_s25, 3  ;;  %p750_p13 = pnand %p467_p10, %p38_p5 }
  0x15   : > { %s163_s29 = sand.u32 1, %s668_s15   ;;  %s879_s1 = sld [smem:[#allocation12_spill]] }
  0x16   : > { %s167_s6 = scalar_lea.vmem [#allocation5], %s435_s27  ;;  %p439_p0 = scmp.ge.s32.totalorder %s668_s15, 1 }
  0x17   : > { %s175_s7 = sshll.u32 %s167_s6, 4  ;;  %s761_s9 = scalar_lea.sflag [#allocation6], %s163_s29  ;;  %s176_s7 = int_to_ptr.vmem [resolvable:$true] %s175_s7 }
  0x18   : > { %p512_p2 = pneg %p750_p13 }
  0x1b   : > { %s171_s5 = scalar_lea.hbm %s879_s1, %s436_s26  ;;  %s515_s20 = scalar_lea.hbm %s879_s1, 16 }
  0x1c   : > { %s173_s8 = sshll.u32 %s171_s5, 4  ;;  %s174_s8 = int_to_ptr.hbm [resolvable:$true] %s173_s8 }
  0x1d   : > { %s508_s10 = sshra.s32 %s174_s8, 4  ;;  %s509_s10 = int_to_ptr.hbm [resolvable:$true] %s508_s10 }
  0x1e   : > { %s510_s11 = scalar_lea.hbm %s509_s10, 8  ;;  %p516_p5 = scmp.lt.s32.totalorder %s509_s10, %s879_s1 }
  0x1f   : > { %p511_p1 = scmp.ne.s32.totalorder %s509_s10, %s510_s11  ;;  %p517_p7 = scmp.lt.s32.totalorder %s515_s20, %s510_s11 }
  0x21   : > { %p513_p3 = pnand %p512_p2, %p511_p1  ;;  %p518_p8 = por %p517_p7, %p516_p5 }
  0x23   : > { %p514_p4 = pneg %p513_p3 }
  0x25   : > { %p519_p10 = pnand %p518_p8, %p514_p4 }
  0x27   : > { %522 = shalt.err (!%p519_p10)
}
  0x28   : > { %459 = dma.hbm_to_vmem [thread:$0]  (!%p750_p13), %s174_s8, 128, %s176_s7, %s761_s9  }
  0x29   : > { %p197_p1 = scmp.lt.s32.totalorder %s668_s15, 3  ;;  %s152_s6 = scalar_lea.hbm %s870_s0, %s436_s26 }
  0x2a   : > { %s154_s11 = sshll.u32 %s152_s6, 4  ;;  %s148_s17 = scalar_lea.vmem [#allocation2], %s435_s27  ;;  %s155_s11 = int_to_ptr.hbm [resolvable:$true] %s154_s11 }
  0x2b   : > { %p783_p3 = pnand %p439_p0, %p197_p1  ;;  %s156_s19 = sshll.u32 %s148_s17, 4  ;;  %s157_s19 = int_to_ptr.vmem [resolvable:$true] %s156_s19 }
  0x2c   : > { %s145_s20 = scalar_lea.sflag [#allocation3], %s746_s25  ;;  %s538_s30 = sshra.s32 %s155_s11, 4  ;;  %s539_s30 = int_to_ptr.hbm [resolvable:$true] %s538_s30 }
  0x2d   : > { %s540_s7 = scalar_lea.hbm %s539_s30, 8  ;;  %s545_s4 = scalar_lea.hbm %s870_s0, 16 }
  0x2e   : > { %p541_p4 = scmp.ne.s32.totalorder %s539_s30, %s540_s7  ;;  %p546_p0 = scmp.lt.s32.totalorder %s539_s30, %s870_s0 }
  0x2f   : > { %p547_p8 = scmp.lt.s32.totalorder %s545_s4, %s540_s7 }
  0x30   : > { %p543_p5 = pnand %p541_p4, %p512_p2 }
  0x31   : > { %p548_p10 = por %p547_p8, %p546_p0 }
  0x32   : > { %p544_p7 = pneg %p543_p5 }
  0x34   : > { %p549_p1 = pnand %p548_p10, %p544_p7 }
  0x36   : > { %552 = shalt.err (!%p549_p1)
}
  0x37   : > { %456 = dma.hbm_to_vmem [thread:$0]  (!%p750_p13), %s155_s11, 128, %s157_s19, %s145_s20  }
  0x38   : > { %s188_s17 = scalar_lea.hbm %s872_s2, %s668_s15  ;;  %s185_s26 = scalar_lea.vmem [#allocation7], %s746_s25 }
  0x39   : > { %s192_s8 = sshll.u32 %s185_s26, 4  ;;  %s190_s1 = sshll.u32 %s188_s17, 4  ;;  %s193_s8 = int_to_ptr.vmem [resolvable:$true] %s192_s8  ;;  %s191_s1 = int_to_ptr.hbm [resolvable:$true] %s190_s1 }
  0x3a   : > { %s568_s30 = sshra.s32 %s191_s1, 4  ;;  %s575_s11 = scalar_lea.hbm %s872_s2, 2  ;;  %s569_s30 = int_to_ptr.hbm [resolvable:$true] %s568_s30 }
  0x3b   : > { %s570_s7 = scalar_lea.hbm %s569_s30, 1  ;;  %p576_p0 = scmp.lt.s32.totalorder %s569_s30, %s872_s2 }
  0x3c   : > { %p571_p4 = scmp.ne.s32.totalorder %s569_s30, %s570_s7  ;;  %p577_p8 = scmp.lt.s32.totalorder %s575_s11, %s570_s7 }
  0x3e   : > { %p573_p5 = pnand %p571_p4, %p512_p2  ;;  %p578_p10 = por %p577_p8, %p576_p0 }
  0x40   : > { %p574_p7 = pneg %p573_p5 }
  0x42   : > { %p579_p1 = pnand %p578_p10, %p574_p7 }
  0x44   : > { %582 = shalt.err (!%p579_p1)
}
  0x45   : > { %462 = dma.hbm_to_vmem [thread:$0]  (!%p750_p13), %s191_s1, 16, %s193_s8, %s761_s9  }
  0x46   : > { %201 = sbr.rel (%p783_p3) target bundleno = 332 (0x14c), region = 32  ;;  %s821_s25 = sand.u32 (!%p783_p3), 1, %s660_s13  }
  0x47   : > { %s440_s5 = sshll.u32 (!%p783_p3), %s821_s25, 3  ;;  %s204_s27 = scalar_lea.sflag (!%p783_p3), [#allocation3], %s821_s25 }
  0x48   : > { %s207_s6 = scalar_lea.vmem (!%p783_p3), [#allocation2], %s440_s5 }
  0x4b   : > { %643 = dma.done.wait (%p730_p6), %s204_s27, 128  }
  0x4c   : > { %645 = vsyncadd (%p730_p6), %s204_s27, 4294967168  ;;  %s213_s1 = sand.u32 1, %s712_s16   ;;  %s217_s9 = scalar_lea.vmem [#allocation5], %s440_s5 }
  0x4d   : > { %s214_s28 = scalar_lea.sflag [#allocation6], %s213_s1 }
  0x4e   : > { %647 = dma.done.wait (%p730_p6), %s214_s28, 144  }
  0x4f   : > { %649 = vsyncadd (%p730_p6), %s214_s28, 4294967152  ;;  %v290_v0 = vlaneseq  ;;  %v258_v2 = vld [vmem:[%s207_s6] sm:$0xff]  ;;  %vm261_vm0 = vcmask 261120   ;;  %v259_v3 = vld [vmem:[%s217_s9] sm:$0xff]  ;;  %s226_s10 = scalar_lea.vmem [#allocation7], %s821_s25  ;;  %v670_v12 = vmov 0   ;;  %s323_s8 = scalar_lea.hbm %s873_s3, %s712_s16 }
  0x50   : > { %v265_v4 = vmul.f32 %v258_v2, %v258_v2  ;;  %v260_v5 = vmul.f32 %v259_v3, %v258_v2  ;;  %v269_v8 = vmul.f32 %v259_v3, %v259_v3  ;;  %v505_v10 = vld [vmem:[%s226_s10] ss:$0 sm:$0xff]  ;;  %503 = vset.pattern.permute.xlu2 %v670_v12  ;;  %504 = vset.pattern.permute.xlu0 %v670_v12  ;;  %s442_s22 = sshll.u32 %s712_s16, 3  ;;  %s257_s30 = scalar_lea.vmem [#allocation8], %s821_s25  ;;  %vm312_vm5 = vcmask 57344  }
  0x51   : > { %v291_v1 = vshrl.u32 %v290_v0, 7  ;;  %v300_v29 = vand.u32 127, %v290_v0  ;;  %v302_v30 = vstv %s442_s22  ;;  %s325_s7 = sshll.u32 %s257_s30, 4  ;;  %s327_s4 = sshll.u32 %s323_s8, 4  ;;  %s326_s7 = int_to_ptr.vmem [resolvable:$true] %s325_s7  ;;  %s328_s4 = int_to_ptr.hbm [resolvable:$true] %s327_s4 }
  0x52   : > { %v266_v6 = vsel %vm261_vm0, %v265_v4, 0.0  ;;  %v262_v7 = vsel %vm261_vm0, %v260_v5, 0.0  ;;  %v270_v9 = vsel %vm261_vm0, %v269_v8, 0.0  ;;  %s315_s29 = scalar_lea.sflag [#allocation4], %s821_s25  ;;  %s612_s11 = sshra.s32 %s328_s4, 4  ;;  %s613_s11 = int_to_ptr.hbm [resolvable:$true] %s612_s11 }
  0x53   : > { %502 = vset.pattern.permute.xlu1 %v291_v1  ;;  %267 = vadd.xlane.f32.xlu0 %v266_v6  ;;  %v303_v31 = vadd.s32 %v302_v30, %v300_v29  ;;  %s614_s19 = scalar_lea.hbm %s613_s11, 1  ;;  %s618_s5 = scalar_lea.hbm %s873_s3, 2 }
  0x54   : > { %263 = vadd.xlane.f32.xlu1 %v262_v7  ;;  %p615_p6 = scmp.ne.s32.totalorder %s613_s11, %s614_s19  ;;  %p619_p3 = scmp.lt.s32.totalorder %s613_s11, %s873_s3 }
  0x55   : > { %vm304_vm4 = vcmp.lt.s32.totalorder %v303_v31, 16  ;;  %p620_p4 = scmp.lt.s32.totalorder %s618_s5, %s614_s19 }
  0x56   : > { %p616_p13 = pnand %p615_p6, %p737_p11 }
  0x57   : > { %p621_p5 = por %p620_p4, %p619_p3 }
  0x58   : > { %p617_p2 = pneg %p616_p13 }
  0x5a   : > { %p622_p7 = pnand %p621_p5, %p617_p2 }
  0x5b   : > { %271 = vadd.xlane.f32.xlu0 %v270_v9 }
  0x6d   : > { %294 = vperm.xlu1 %502, %v505_v10  }
  0xc6   : > { %v268_v11 = vpop.xlane.xlu0 %267 }
  0xc7   : > { %v273_v14 = vmax.f32 %v268_v11, 1e-16  ;;  %v264_v20 = vpop.xlane.xlu1 %263 }
  0xce   : > { %v272_v13 = vpop.xlane.xlu0 %271 }
  0xcf   : > { %v274_v15 = vmax.f32 %v272_v13, 1e-16 }
  0xd1   : > { %v275_v16 = vmul.f32 %v274_v15, %v273_v14 }
  0xd3   : > { %506 = vrsqrt.f32 %v275_v16  ;;  %vm282_vm2 = vweird.f32 %v275_v16 }
  0xd9   : > { %v507_v17 = vpop.eup %506 }
  0xda   : > { %v277_v18 = vmul.f32 %v507_v17, %v275_v16  ;;  %vm283_vm1 = vweird.f32 %v507_v17 }
  0xdb   : > { %vm284_vm3 = vmor %vm282_vm2, %vm283_vm1 }
  0xdc   : > { %v278_v19 = vmul.f32 %v507_v17, %v277_v18 }
  0xde   : > { %v279_v21 = vmul.f32 0.5, %v278_v19 }
  0xdf   : > { %v295_v25 = vpop.permute.xlu1 %294 }
  0xe0   : > { %v280_v22 = vsub.f32 1.5, %v279_v21 }
  0xe2   : > { %v281_v23 = vmul.f32 %v507_v17, %v280_v22 }
  0xe4   : > { %v285_v24 = vsel %vm284_vm3, %v507_v17, %v281_v23 }
  0xe5   : > { %v286_v26 = vmul.f32 %v285_v24, %v264_v20 }
  0xe7   : > { %v297_v27 = vsub.f32 %v286_v26, %v295_v25 }
  0xe9   : > { %v298_v28 = vmul.f32 %v297_v27, %v297_v27 }
  0xeb   : > { %307 = vperm.xlu2 %503, %v298_v28  }
 0x145   : > { %v308_v32 = vpop.permute.xlu2 %307 }
 0x146   : > { %v309_v33 = vperm.slane %v308_v32, %v300_v29 }
 0x148   : > { %v311_v34 = vsel %vm304_vm4, %v309_v33, 0.0 }
 0x149   : > { %313 = vst.msk [vmem:[%s257_s30] sm:$0x1] %vm312_vm5, %v311_v34 }
 0x14a   : > { %625 = shalt.err (!%p622_p7)
}
 0x14b   : > { %451 = dma.vmem_to_hbm [thread:$0]  (%p737_p11), %s326_s7, 16, %s328_s4, %s315_s29  }
 0x14c PF: > { %s339_s25 = sand.u32 1, %s656_s12   ;;  %p464_p0 = pnand %p434_p9, %p741_p12 }
 0x14d   : > { %s340_s1 = scalar_lea.sflag [#allocation4], %s339_s25 }
 0x14e   : > { %p465_p8 = pneg %p464_p0 }
 0x150   : > { %651 = dma.done.wait (%p465_p8), %s340_s1, 16  }
 0x151   : > { %653 = vsyncadd (%p465_p8), %s340_s1, 4294967280  ;;  %p19_p10 = scmp.ge.s32.totalorder %s716_s18, 4   ;;  %s881_s12 = smov %s660_s13 }
 0x152   : > { %s882_s13 = smov %s664_s14  ;;  %s883_s14 = smov %s728_s21 }
 0x153   : > { %s884_s15 = smov %s716_s18  ;;  %21 = sbr.rel (!%p19_p10) target bundleno = 9 (0x9), region = 101 }
 0x158   :  { %345 = vsyncpa [#allocation3], 1 }
 0x159   :  { %347 = vsyncpa [#allocation3 + $0x1], 1 }
 0x15a   :  { %348 = vsyncpa [#allocation6], 1 }
 0x15b   :  { %350 = vsyncpa [#allocation6 + $0x1], 1 }
 0x15c   :  { %351 = vsyncpa [#allocation4], 1 }
 0x15d   :  { %353 = vsyncpa [#allocation4 + $0x1], 1 }

</bundles_post_ra>
